<compile_context>
chip_gen: v5e
topology: v5e:2x2
jax: 0.10.0
libtpu: 0.0.40
codegen_flags: <defaults>
</compile_context>

<pallas_src>
import jax
import jax.numpy as jnp
from jax.experimental import pallas as pl
from jax.experimental.pallas import tpu as pltpu

LANES = 128      # vreg lane width
SUBLANES = 8     # vreg sublane height for f32

# Below this batch size a single tile covers everything; plain XLA is cheaper
# than (pad + pallas_call + slice) dispatch overhead.
_XLA_SMALL_BATCH_THRESHOLD = 1024


def _round_up(n: int, m: int) -> int:
    return ((n + m - 1) // m) * m


def pi_kernel(w_ref, x_ref, o_ref):
    """w_ref: (P,) f32 in SMEM; x_ref / o_ref: (TB, 128) f32 lane-dense tiles.

    o = prod_j (x - w[j]) via statically-unrolled scalar-broadcast multiply
    chains. The chain is split into a few independent partial products so the
    loop-carried multiply does not serialize the 4 VALU slots once P grows.
    """
    x = x_ref[...]
    p = w_ref.shape[0]

    # Number of independent accumulators (compile-time choice).
    n_acc = 1 if p <= 4 else (2 if p <= 16 else 4)
    n_acc = min(n_acc, p)

    accs = [x - w_ref[j] for j in range(n_acc)]
    for j in range(n_acc, p):          # P is small & static -> full unroll (VPU only)
        k = j % n_acc
        accs[k] = accs[k] * (x - w_ref[j])

    acc = accs[0]
    for k in range(1, n_acc):
        acc = acc * accs[k]

    # TODO(synk): for very large poly_order, accumulate sign + log|.| to avoid
    # f32 overflow/underflow of the running product.
    o_ref[...] = acc


def pi_forward(x, w, *, tile_rows: int = 2048,
               small_batch_threshold: int = _XLA_SMALL_BATCH_THRESHOLD):
    """x: (B, 1) f32, w: (1, P) f32  ->  (B, 1) f32 = prod_j (x - w_j)."""
    assert x.ndim == 2 and x.shape[1] == 1, "Pi expects x of shape (B, 1)"
    assert w.ndim == 2 and w.shape[0] == 1, "Pi expects w of shape (1, P)"
    B = x.shape[0]
    P = w.shape[1]
    dtype = x.dtype

    # Small batches: launch/overhead dominated -> let XLA do it directly.
    if B <= small_batch_threshold:
        return jnp.prod(x - w, axis=1, keepdims=True)

    # ---- lane-dense layout: flatten B onto the 128-lane axis ----------------
    rows = max(pl.cdiv(B, LANES), 1)                 # rows of 128 lanes
    rows_padded = _round_up(rows, SUBLANES)          # pad only to sublane granule
    padded = rows_padded * LANES

    # Tile rows: multiple of 8, no bigger than the slab, and capped so the
    # "parallel" grid axis has >= 2 blocks whenever there is enough work
    # (lets v7x shard across both TensorCores; harmless on v5e/v6e).
    tb = _round_up(max(tile_rows, SUBLANES), SUBLANES)
    tb = min(tb, rows_padded)
    if rows_padded >= 2 * SUBLANES:
        tb = min(tb, _round_up(pl.cdiv(rows_padded, 2), SUBLANES))

    grid = (pl.cdiv(rows_padded, tb),)               # ragged last block is fine

    # Pad is a no-op when B is already a multiple of 1024; trailing garbage in
    # padded lanes is sliced off below.
    x_flat = jnp.pad(x.reshape(-1), (0, padded - B))
    x2d = x_flat.reshape(rows_padded, LANES)         # lane-dense slab
    w_flat = w.reshape(-1)                           # (P,) scalars -> SMEM

    out2d = pl.pallas_call(
        pi_kernel,
        out_shape=jax.ShapeDtypeStruct((rows_padded, LANES), dtype),
        grid=grid,
        in_specs=[
            # tiny parameter vector lives in SMEM: scalar-slot reads, free
            # broadcast into the VPU multiply chain, no wasted vregs/VMEM.
            pl.BlockSpec(memory_space=pltpu.MemorySpace.SMEM),
            # x: lane-dense (TB, 128) tiles, auto double-buffered by Pallas.
            pl.BlockSpec((tb, LANES), lambda i: (i, 0)),
        ],
        out_specs=pl.BlockSpec((tb, LANES), lambda i: (i, 0)),
        compiler_params=pltpu.CompilerParams(
            # B tiles are independent -> shard across TensorCores on v7x.
            dimension_semantics=("parallel",),
        ),
        cost_estimate=pl.CostEstimate(
            flops=2 * padded * P,
            transcendentals=0,
            bytes_accessed=2 * padded * 4 + P * 4,
        ),
    )(w_flat, x2d)

    # un-reshape the lane-dense slab back to (B, 1); keep the [:B] slice --
    # padded lanes hold garbage.
    return out2d.reshape(-1)[:B].reshape(B, 1)


if __name__ == "__main__":
    poly_order = 8

    key = jax.random.PRNGKey(0)
    kx, kw, kx2 = jax.random.split(key, 3)

    # Deterministic stand-ins for torch.randn((1, poly_order)) and the input.
    w = jax.random.normal(kw, (1, poly_order), dtype=jnp.float32)

    # 1) Small batch, forced through the Pallas path (single tile).
    x = jax.random.normal(kx, (8, 1), dtype=jnp.float32)
    out = pi_forward(x, w, small_batch_threshold=0)
    jax.block_until_ready(out)
    ref = jnp.prod(x - w, axis=1, keepdims=True)
    assert out.shape == (8, 1)
    assert jnp.allclose(out, ref, rtol=1e-5, atol=1e-5)

    # 2) Small batch via the default (XLA-gated) path.
    out_xla = pi_forward(x, w)
    jax.block_until_ready(out_xla)
    assert jnp.allclose(out_xla, ref, rtol=1e-5, atol=1e-5)

    # 3) Batch > 128 with a tiny tile: multi-tile grid + padding/slicing path.
    x_big = jax.random.normal(kx2, (2053, 1), dtype=jnp.float32)
    out_big = pi_forward(x_big, w, tile_rows=8)
    jax.block_until_ready(out_big)
    ref_big = jnp.prod(x_big - w, axis=1, keepdims=True)
    assert out_big.shape == (2053, 1)
    assert jnp.allclose(out_big, ref_big, rtol=1e-5, atol=1e-5)

    # 4) Non-multiple-of-8 tile_rows + ragged final block path.
    out_big2 = pi_forward(x_big, w, tile_rows=100)
    jax.block_until_ready(out_big2)
    assert jnp.allclose(out_big2, ref_big, rtol=1e-5, atol=1e-5)

    print("KERNEL_OK")
</pallas_src>

<mosaic_0001>
module attributes {stable_mosaic.version = 11 : i64} {
  func.func @pi_kernel(%arg0: i32, %arg1: memref<8xf32, #tpu.memory_space<smem>>, %arg2: memref<8x128xf32, #tpu.memory_space<vmem>>, %arg3: memref<8x128xf32, #tpu.memory_space<vmem>>) attributes {dimension_semantics = [#tpu.dimension_semantics<parallel>], iteration_bounds = array<i64: 1>, scalar_prefetch = 0 : i64, scratch_operands = 0 : i64, tpu.core_type = #tpu.core_type<tc>, window_params = [{transform_indices = @transform_0, window_bounds = array<i64: 8>}, {transform_indices = @transform_1, window_bounds = array<i64: 8, 128>}, {transform_indices = @transform_2, window_bounds = array<i64: 8, 128>}]} {
    %c0 = arith.constant 0 : index
    %c0_0 = arith.constant 0 : index
    %0 = vector.load %arg2[%c0, %c0_0] : memref<8x128xf32, #tpu.memory_space<vmem>>, vector<8x128xf32>
    %c0_1 = arith.constant 0 : index
    %1 = memref.load %arg1[%c0_1] : memref<8xf32, #tpu.memory_space<smem>>
    %2 = vector.broadcast %1 : f32 to vector<8x128xf32>
    %3 = arith.subf %0, %2 : vector<8x128xf32>
    %c1 = arith.constant 1 : index
    %4 = memref.load %arg1[%c1] : memref<8xf32, #tpu.memory_space<smem>>
    %5 = vector.broadcast %4 : f32 to vector<8x128xf32>
    %6 = arith.subf %0, %5 : vector<8x128xf32>
    %c2 = arith.constant 2 : index
    %7 = memref.load %arg1[%c2] : memref<8xf32, #tpu.memory_space<smem>>
    %8 = vector.broadcast %7 : f32 to vector<8x128xf32>
    %9 = arith.subf %0, %8 : vector<8x128xf32>
    %10 = arith.mulf %3, %9 : vector<8x128xf32>
    %c3 = arith.constant 3 : index
    %11 = memref.load %arg1[%c3] : memref<8xf32, #tpu.memory_space<smem>>
    %12 = vector.broadcast %11 : f32 to vector<8x128xf32>
    %13 = arith.subf %0, %12 : vector<8x128xf32>
    %14 = arith.mulf %6, %13 : vector<8x128xf32>
    %c4 = arith.constant 4 : index
    %15 = memref.load %arg1[%c4] : memref<8xf32, #tpu.memory_space<smem>>
    %16 = vector.broadcast %15 : f32 to vector<8x128xf32>
    %17 = arith.subf %0, %16 : vector<8x128xf32>
    %18 = arith.mulf %10, %17 : vector<8x128xf32>
    %c5 = arith.constant 5 : index
    %19 = memref.load %arg1[%c5] : memref<8xf32, #tpu.memory_space<smem>>
    %20 = vector.broadcast %19 : f32 to vector<8x128xf32>
    %21 = arith.subf %0, %20 : vector<8x128xf32>
    %22 = arith.mulf %14, %21 : vector<8x128xf32>
    %c6 = arith.constant 6 : index
    %23 = memref.load %arg1[%c6] : memref<8xf32, #tpu.memory_space<smem>>
    %24 = vector.broadcast %23 : f32 to vector<8x128xf32>
    %25 = arith.subf %0, %24 : vector<8x128xf32>
    %26 = arith.mulf %18, %25 : vector<8x128xf32>
    %c7 = arith.constant 7 : index
    %27 = memref.load %arg1[%c7] : memref<8xf32, #tpu.memory_space<smem>>
    %28 = vector.broadcast %27 : f32 to vector<8x128xf32>
    %29 = arith.subf %0, %28 : vector<8x128xf32>
    %30 = arith.mulf %22, %29 : vector<8x128xf32>
    %31 = arith.mulf %26, %30 : vector<8x128xf32>
    %c0_2 = arith.constant 0 : index
    %c0_3 = arith.constant 0 : index
    %32 = vector.load %arg3[%c0_2, %c0_3] : memref<8x128xf32, #tpu.memory_space<vmem>>, vector<8x128xf32>
    tpu.vector_store %arg3[%c0_2, %c0_3], %31 {strides = array<i32>} : memref<8x128xf32, #tpu.memory_space<vmem>>, vector<8x128xf32>,
    return
  }
  func.func @transform_0(%arg0: i32) -> i32 {
    %c0_i32 = arith.constant 0 : i32
    %c0_i32_0 = arith.constant 0 : i32
    return %c0_i32 : i32
  }
  func.func @transform_1(%arg0: i32) -> (i32, i32) {
    %c0_i32 = arith.constant 0 : i32
    %c0_i32_0 = arith.constant 0 : i32
    return %arg0, %c0_i32 : i32, i32
  }
  func.func @transform_2(%arg0: i32) -> (i32, i32) {
    %c0_i32 = arith.constant 0 : i32
    %c0_i32_0 = arith.constant 0 : i32
    return %arg0, %c0_i32 : i32, i32
  }
}

</mosaic_0001>

<bundles_post_ra>
// kernel: tpu_custom_call.1
= control target key start
LH: loop header
LB: loop body
LE: loop exit
PB: predicated region body
PF: predicated region fallthrough
CT: control target
= control target key end

     0   :  { %7 = vsyncpa [#allocation5], 0  ;;  %s193_s0 = inlined_call_operand.hbm [shape: f32[8], index: 0, kind: input, shape index: {}]   ;;  %s194_s1 = inlined_call_operand.hbm [shape: f32[8,128], index: 1, kind: input, shape index: {}]   ;;  %s195_s2 = inlined_call_operand.hbm [shape: f32[8,128], index: 2, kind: output, shape index: {}]  }
   0x1   :  { %8 = vsyncpa [#allocation3], 0 }
   0x2   :  { %9 = vsyncpa [#allocation4], 0  ;;  %s15_s11 = sshll.u32 %s193_s0, 4  ;;  %s24_s14 = sshll.u32 %s194_s1, 4  ;;  %s16_s11 = int_to_ptr.hbm [resolvable:$true] %s15_s11  ;;  %s25_s14 = int_to_ptr.hbm [resolvable:$true] %s24_s14 }
   0x3   :  { %s166_s15 = smov [#allocation2]   ;;  %s167_s16 = smov [#allocation6]  }
   0x4   :  { %18 = dma.hbm_to_smem %s16_s11, 16, %s166_s15, [#allocation5]  }
   0x5   :  { %s26_s17 = sshll.u32 %s167_s16, 4  ;;  %s27_s17 = int_to_ptr.vmem [resolvable:$true] %s26_s17 }
   0x6   :  { %29 = dma.hbm_to_vmem [thread:$0]  %s25_s14, 128, %s27_s17, [#allocation3]  }
   0x7   :  { %160 = dma.done.wait [#allocation5], 16  }
   0x8   :  { %161 = vsyncadd [#allocation5], 4294967280 }
   0x9   :  { %162 = dma.done.wait [#allocation3], 128  }
   0xa   :  { %163 = vsyncadd [#allocation3], 4294967168 }
   0xb   :  { %38 = sfence }
   0xc   :  { %s40_s18 = sld [smem:[#allocation2]]  ;;  %v39_v0 = vld [vmem:[#allocation6] sm:$0xff]  ;;  %s168_s24 = smov [#allocation7]  }
   0xd   :  { %s90_s19 = sld [smem:[#allocation2 + $0x1]]  ;;  %s77_s25 = sshll.u32 %s168_s24, 4  ;;  %s78_s25 = int_to_ptr.vmem [resolvable:$true] %s77_s25 }
   0xe   :  { %s91_s0 = sld [smem:[#allocation2 + $0x2]]  ;;  %s79_s28 = sshll.u32 %s195_s2, 4  ;;  %s80_s28 = int_to_ptr.hbm [resolvable:$true] %s79_s28 }
   0xf   :  { %s92_s20 = sld [smem:[#allocation2 + $0x3]] }
  0x10   :  { %s93_s21 = sld [smem:[#allocation2 + $0x4]] }
  0x11   :  { %s94_s22 = sld [smem:[#allocation2 + $0x5]] }
  0x12   :  { %v41_v1 = vstv %s40_s18  ;;  %s95_s1 = sld [smem:[#allocation2 + $0x6]] }
  0x13   :  { %v42_v2 = vsub.f32 %v39_v0, %v41_v1  ;;  %v44_v3 = vstv %s90_s19  ;;  %s96_s23 = sld [smem:[#allocation2 + $0x7]] }
  0x14   :  { %v45_v4 = vsub.f32 %v39_v0, %v44_v3  ;;  %v47_v5 = vstv %s91_s0 }
  0x15   :  { %v48_v6 = vsub.f32 %v39_v0, %v47_v5  ;;  %v51_v7 = vstv %s92_s20 }
  0x16   :  { %v52_v8 = vsub.f32 %v39_v0, %v51_v7  ;;  %v55_v9 = vstv %s93_s21 }
  0x17   :  { %v49_v10 = vmul.f32 %v48_v6, %v42_v2  ;;  %v56_v11 = vsub.f32 %v39_v0, %v55_v9  ;;  %v59_v12 = vstv %s94_s22 }
  0x18   :  { %v53_v13 = vmul.f32 %v52_v8, %v45_v4  ;;  %v60_v14 = vsub.f32 %v39_v0, %v59_v12  ;;  %v63_v15 = vstv %s95_s1 }
  0x19   :  { %v57_v16 = vmul.f32 %v56_v11, %v49_v10  ;;  %v64_v17 = vsub.f32 %v39_v0, %v63_v15  ;;  %v67_v18 = vstv %s96_s23 }
  0x1a   :  { %v61_v19 = vmul.f32 %v60_v14, %v53_v13  ;;  %v68_v20 = vsub.f32 %v39_v0, %v67_v18 }
  0x1b   :  { %v65_v21 = vmul.f32 %v64_v17, %v57_v16 }
  0x1c   :  { %v69_v22 = vmul.f32 %v68_v20, %v61_v19 }
  0x1e   :  { %v70_v23 = vmul.f32 %v69_v22, %v65_v21 }
  0x20   :  { %71 = vst [vmem:[#allocation7] sm:$0xff] %v70_v23 }
  0x21   :  { %82 = dma.vmem_to_hbm [thread:$0]  %s78_s25, 128, %s80_s28, [#allocation4]  }
  0x22   :  { %164 = dma.done.wait [#allocation4], 128  }
  0x23   :  { %165 = vsyncadd [#allocation4], 4294967168 }
  0x24   :  { %87 = vsyncpa [#allocation3], 1 }
  0x25   :  { %88 = vsyncpa [#allocation4], 1 }
  0x26   :  { %89 = vsyncpa [#allocation5], 1 }

</bundles_post_ra>
